<compile_context>
chip_gen: v7x
topology: tpu7x:2x2x1
jax: 0.10.0
libtpu: 0.0.40
codegen_flags: <defaults>
</compile_context>

<pallas_src>
import jax
import jax.numpy as jnp
from jax.experimental import pallas as pl
from jax.experimental.pallas import tpu as pltpu


def _mlp_kernel(x_ref, w1_ref, b1_ref, w2_ref, b2_ref, w3_ref, b3_ref, o_ref):
    # x_ref: (TB, D) bf16 tile of the batch; weights/biases resident across grid.
    x = x_ref[...]

    # fc1 (+ folded BatchNorm1d) + ReLU; dropout1 == identity in eval.
    h1 = jnp.dot(x, w1_ref[...], preferred_element_type=jnp.float32)
    h1 = jnp.maximum(h1 + b1_ref[...], 0.0).astype(jnp.bfloat16)

    # fc2 (+ folded BatchNorm1d) + ReLU; dropout2 == identity in eval.
    h2 = jnp.dot(h1, w2_ref[...], preferred_element_type=jnp.float32)
    h2 = jnp.maximum(h2 + b2_ref[...], 0.0).astype(jnp.bfloat16)

    # fc3: contract the 64-dim feature axis of h2 against the replicated w3
    # rows, producing a lane-dense (8, TB) MXU result; row 0 carries the logits.
    scores = jax.lax.dot_general(
        w3_ref[...], h2,
        dimension_numbers=(((1,), (1,)), ((), ())),
        preferred_element_type=jnp.float32)            # (8, TB)
    logits = scores[0:1, :] + b3_ref[0, 0]             # (1, TB), scalar from SMEM

    # Sigmoid in f32: exp on the EUP, reciprocal on the EUP slot as well.
    o_ref[...] = pl.reciprocal(1.0 + jnp.exp(-logits), approx=True).astype(o_ref.dtype)


@jax.jit
def simple_binary_classifier_forward(x, params):
    """x: [B, D] float32.  params: dict from init_params.  Returns [B, 1] f32."""
    B, D = x.shape

    # Lane-dense batch tile (multiple of 128), capped so double-buffered x tiles
    # plus resident weights stay far under every chip's VMEM budget.
    tile_b = max(128, min(1024, pl.cdiv(B, 128) * 128))
    b_pad = pl.cdiv(B, tile_b) * tile_b
    num_tiles = b_pad // tile_b

    x_p = x.astype(jnp.bfloat16)            # halve HBM bytes for the x DMA
    if b_pad != B:
        x_p = jnp.pad(x_p, ((0, b_pad - B), (0, 0)))   # zero tail rows (sliced off)

    def resident(shape):
        return pl.BlockSpec(shape, lambda i: (0, 0))

    out = pl.pallas_call(
        _mlp_kernel,
        out_shape=jax.ShapeDtypeStruct((1, b_pad), jnp.float32),
        grid=(num_tiles,),
        in_specs=[
            pl.BlockSpec((tile_b, D), lambda i: (i, 0)),            # x tile
            resident(params["w1"].shape),                           # (D, 128) bf16
            resident(params["b1"].shape),                           # (1, 128) f32
            resident(params["w2"].shape),                           # (128, 64) bf16
            resident(params["b2"].shape),                           # (1, 64)  f32
            resident(params["w3"].shape),                           # (8, 64)  bf16
            pl.BlockSpec(memory_space=pltpu.MemorySpace.SMEM),      # b3 scalar (1,1)
        ],
        out_specs=pl.BlockSpec((1, tile_b), lambda i: (0, i)),      # lane-dense row
        compiler_params=pltpu.CompilerParams(
            dimension_semantics=("parallel",)),
    )(x_p, params["w1"], params["b1"], params["w2"], params["b2"],
      params["w3"], params["b3"])

    # (1, B_pad) row slab -> (B, 1) column, dropping padded rows.
    return out.reshape(b_pad, 1)[:B]


def init_params(key, input_size):
    """Deterministic init matching the PyTorch module's parameter shapes.

    nn.Linear default init ([out, in], uniform +-1/sqrt(in)); BatchNorm1d at
    its init values (gamma=1, beta=0, running_mean=0, running_var=1) folded
    into the preceding Linear's weights/bias.  MXU operands stored as bf16.

    Returns (kernel_params, raw_params); raw_params are the un-fused f32
    weights used only by the pure-JAX reference check.
    """
    k1, k2, k3, k4, k5, k6 = jax.random.split(key, 6)

    def linear(kw, kb, fan_in, fan_out):
        bound = 1.0 / float(jnp.sqrt(jnp.float32(fan_in)))
        w = jax.random.uniform(kw, (fan_out, fan_in), jnp.float32, -bound, bound)
        b = jax.random.uniform(kb, (fan_out,), jnp.float32, -bound, bound)
        return w.T, b                       # [in, out], [out]

    w1, b1 = linear(k1, k2, input_size, 128)
    w2, b2 = linear(k3, k4, 128, 64)
    w3, b3 = linear(k5, k6, 64, 1)

    eps = 1e-5
    def bn_fold(n):
        gamma = jnp.ones((n,), jnp.float32)
        beta = jnp.zeros((n,), jnp.float32)
        mean = jnp.zeros((n,), jnp.float32)
        var = jnp.ones((n,), jnp.float32)
        scale = gamma / jnp.sqrt(var + eps)        # y = z*scale + shift
        shift = beta - mean * scale
        return scale, shift

    s1, t1 = bn_fold(128)
    s2, t2 = bn_fold(64)

    # Fold BN into the Linear layers; bf16 weights, f32 biases.
    kernel_params = {
        "w1": (w1 * s1[None, :]).astype(jnp.bfloat16),
        "b1": (b1 * s1 + t1).reshape(1, 128).astype(jnp.float32),
        "w2": (w2 * s2[None, :]).astype(jnp.bfloat16),
        "b2": (b2 * s2 + t2).reshape(1, 64).astype(jnp.float32),
        "w3": jnp.tile(w3.T, (8, 1)).astype(jnp.bfloat16),   # (8, 64) replicated rows
        "b3": b3.reshape(1, 1).astype(jnp.float32),          # SMEM scalar
    }
    raw_params = {"w1": w1, "b1": b1, "w2": w2, "b2": b2, "w3": w3, "b3": b3}
    return kernel_params, raw_params


def reference_forward(x, raw):
    """Pure-JAX f32 reference of SimpleBinaryClassifier.eval().forward(x)."""
    eps = 1e-5
    h = x @ raw["w1"] + raw["b1"]
    h = h / jnp.sqrt(1.0 + eps)          # BN1 eval: mean=0, var=1, gamma=1, beta=0
    h = jnp.maximum(h, 0.0)              # dropout1: identity in eval
    h = h @ raw["w2"] + raw["b2"]
    h = h / jnp.sqrt(1.0 + eps)          # BN2 eval
    h = jnp.maximum(h, 0.0)              # dropout2: identity in eval
    z = h @ raw["w3"] + raw["b3"]
    return jax.nn.sigmoid(z)


if __name__ == "__main__":
    key = jax.random.PRNGKey(0)
    k_param, k_x = jax.random.split(key)

    input_size = 32
    batch = 8

    params, raw = init_params(k_param, input_size)
    x = jax.random.normal(k_x, (batch, input_size), jnp.float32)

    out = simple_binary_classifier_forward(x, params)
    out = jax.block_until_ready(out)

    assert out.shape == (batch, 1)
    assert bool(jnp.all(jnp.isfinite(out)))
    assert bool(jnp.all((out >= 0.0) & (out <= 1.0)))

    ref = reference_forward(x, raw)
    assert bool(jnp.allclose(out, ref, atol=2e-2, rtol=2e-2)), (
        f"max abs err {float(jnp.max(jnp.abs(out - ref)))}")

    print("KERNEL_OK")
</pallas_src>

<mosaic_0001>
module attributes {stable_mosaic.version = 11 : i64} {
  func.func @_mlp_kernel(%arg0: i32, %arg1: memref<128x32xbf16, #tpu.memory_space<vmem>>, %arg2: memref<32x128xbf16, #tpu.memory_space<vmem>>, %arg3: memref<1x128xf32, #tpu.memory_space<vmem>>, %arg4: memref<128x64xbf16, #tpu.memory_space<vmem>>, %arg5: memref<1x64xf32, #tpu.memory_space<vmem>>, %arg6: memref<8x64xbf16, #tpu.memory_space<vmem>>, %arg7: memref<1x1xf32, #tpu.memory_space<smem>>, %arg8: memref<1x128xf32, #tpu.memory_space<vmem>>) attributes {dimension_semantics = [#tpu.dimension_semantics<parallel>], iteration_bounds = array<i64: 1>, scalar_prefetch = 0 : i64, scratch_operands = 0 : i64, tpu.core_type = #tpu.core_type<tc>, window_params = [{transform_indices = @transform_0, window_bounds = array<i64: 128, 32>}, {pipeline_mode = #tpu.pipeline_mode<synchronous>, transform_indices = @transform_1, window_bounds = array<i64: 32, 128>}, {pipeline_mode = #tpu.pipeline_mode<synchronous>, transform_indices = @transform_2, window_bounds = array<i64: 1, 128>}, {pipeline_mode = #tpu.pipeline_mode<synchronous>, transform_indices = @transform_3, window_bounds = array<i64: 128, 64>}, {pipeline_mode = #tpu.pipeline_mode<synchronous>, transform_indices = @transform_4, window_bounds = array<i64: 1, 64>}, {pipeline_mode = #tpu.pipeline_mode<synchronous>, transform_indices = @transform_5, window_bounds = array<i64: 8, 64>}, {transform_indices = @transform_6, window_bounds = array<i64: 1, 1>}, {transform_indices = @transform_7, window_bounds = array<i64: 1, 128>}]} {
    %c0 = arith.constant 0 : index
    %c0_0 = arith.constant 0 : index
    %0 = vector.load %arg1[%c0, %c0_0] : memref<128x32xbf16, #tpu.memory_space<vmem>>, vector<128x32xbf16>
    %c0_1 = arith.constant 0 : index
    %c0_2 = arith.constant 0 : index
    %1 = vector.load %arg2[%c0_1, %c0_2] : memref<32x128xbf16, #tpu.memory_space<vmem>>, vector<32x128xbf16>
    %cst = arith.constant dense<0.000000e+00> : vector<128x128xf32>
    %2 = tpu.matmul %0, %1, %cst {dimension_numbers = #tpu.dot_dimension_numbers<[1], [0], [0], [1], [0, 0, 1, 1], [], []>} : vector<128x32xbf16>, vector<32x128xbf16>, vector<128x128xf32> -> vector<128x128xf32>
    %c0_3 = arith.constant 0 : index
    %c0_4 = arith.constant 0 : index
    %3 = vector.load %arg3[%c0_3, %c0_4] : memref<1x128xf32, #tpu.memory_space<vmem>>, vector<1x128xf32>
    %4 = vector.broadcast %3 : vector<1x128xf32> to vector<128x128xf32>
    %5 = arith.addf %2, %4 : vector<128x128xf32>
    %cst_5 = arith.constant 0.000000e+00 : f32
    %6 = vector.broadcast %cst_5 : f32 to vector<128x128xf32>
    %7 = arith.maximumf %5, %6 : vector<128x128xf32>
    %8 = arith.truncf %7 : vector<128x128xf32> to vector<128x128xbf16>
    %c0_6 = arith.constant 0 : index
    %c0_7 = arith.constant 0 : index
    %9 = vector.load %arg4[%c0_6, %c0_7] : memref<128x64xbf16, #tpu.memory_space<vmem>>, vector<128x64xbf16>
    %cst_8 = arith.constant dense<0.000000e+00> : vector<128x64xf32>
    %10 = tpu.matmul %8, %9, %cst_8 {dimension_numbers = #tpu.dot_dimension_numbers<[1], [0], [0], [1], [0, 0, 1, 1], [], []>} : vector<128x128xbf16>, vector<128x64xbf16>, vector<128x64xf32> -> vector<128x64xf32>
    %c0_9 = arith.constant 0 : index
    %c0_10 = arith.constant 0 : index
    %11 = vector.load %arg5[%c0_9, %c0_10] : memref<1x64xf32, #tpu.memory_space<vmem>>, vector<1x64xf32>
    %12 = vector.broadcast %11 : vector<1x64xf32> to vector<128x64xf32>
    %13 = arith.addf %10, %12 : vector<128x64xf32>
    %cst_11 = arith.constant 0.000000e+00 : f32
    %14 = vector.broadcast %cst_11 : f32 to vector<128x64xf32>
    %15 = arith.maximumf %13, %14 : vector<128x64xf32>
    %16 = arith.truncf %15 : vector<128x64xf32> to vector<128x64xbf16>
    %c0_12 = arith.constant 0 : index
    %c0_13 = arith.constant 0 : index
    %17 = vector.load %arg6[%c0_12, %c0_13] : memref<8x64xbf16, #tpu.memory_space<vmem>>, vector<8x64xbf16>
    %cst_14 = arith.constant dense<0.000000e+00> : vector<8x128xf32>
    %18 = tpu.matmul %17, %16, %cst_14 {dimension_numbers = #tpu.dot_dimension_numbers<[1], [1], [0], [0], [0, 0, 1, 0], [], []>} : vector<8x64xbf16>, vector<128x64xbf16>, vector<8x128xf32> -> vector<8x128xf32>
    %19 = vector.extract_strided_slice %18 {offsets = [0, 0], sizes = [1, 128], strides = [1, 1]} : vector<8x128xf32> to vector<1x128xf32>
    %c0_15 = arith.constant 0 : index
    %c0_16 = arith.constant 0 : index
    %20 = memref.load %arg7[%c0_15, %c0_16] : memref<1x1xf32, #tpu.memory_space<smem>>
    %21 = vector.broadcast %20 : f32 to vector<1x128xf32>
    %22 = arith.addf %19, %21 : vector<1x128xf32>
    %cst_17 = arith.constant 0.000000e+00 : f32
    %23 = vector.broadcast %cst_17 : f32 to vector<1x128xf32>
    %24 = arith.subf %23, %22 : vector<1x128xf32>
    %25 = math.exp %24 : vector<1x128xf32>
    %cst_18 = arith.constant 1.000000e+00 : f32
    %26 = vector.broadcast %cst_18 : f32 to vector<1x128xf32>
    %27 = arith.addf %26, %25 : vector<1x128xf32>
    %28 = tpu.reciprocal %27 {approx = true} : vector<1x128xf32> -> vector<1x128xf32>
    %c0_19 = arith.constant 0 : index
    %c0_20 = arith.constant 0 : index
    %29 = vector.load %arg8[%c0_19, %c0_20] : memref<1x128xf32, #tpu.memory_space<vmem>>, vector<1x128xf32>
    tpu.vector_store %arg8[%c0_19, %c0_20], %28 {strides = array<i32>} : memref<1x128xf32, #tpu.memory_space<vmem>>, vector<1x128xf32>,
    return
  }
  func.func @transform_0(%arg0: i32) -> (i32, i32) {
    %c0_i32 = arith.constant 0 : i32
    %c0_i32_0 = arith.constant 0 : i32
    return %arg0, %c0_i32 : i32, i32
  }
  func.func @transform_1(%arg0: i32) -> (i32, i32) {
    %c0_i32 = arith.constant 0 : i32
    %c0_i32_0 = arith.constant 0 : i32
    %c0_i32_1 = arith.constant 0 : i32
    return %c0_i32, %c0_i32_0 : i32, i32
  }
  func.func @transform_2(%arg0: i32) -> (i32, i32) {
    %c0_i32 = arith.constant 0 : i32
    %c0_i32_0 = arith.constant 0 : i32
    %c0_i32_1 = arith.constant 0 : i32
    return %c0_i32, %c0_i32_0 : i32, i32
  }
  func.func @transform_3(%arg0: i32) -> (i32, i32) {
    %c0_i32 = arith.constant 0 : i32
    %c0_i32_0 = arith.constant 0 : i32
    %c0_i32_1 = arith.constant 0 : i32
    return %c0_i32, %c0_i32_0 : i32, i32
  }
  func.func @transform_4(%arg0: i32) -> (i32, i32) {
    %c0_i32 = arith.constant 0 : i32
    %c0_i32_0 = arith.constant 0 : i32
    %c0_i32_1 = arith.constant 0 : i32
    return %c0_i32, %c0_i32_0 : i32, i32
  }
  func.func @transform_5(%arg0: i32) -> (i32, i32) {
    %c0_i32 = arith.constant 0 : i32
    %c0_i32_0 = arith.constant 0 : i32
    %c0_i32_1 = arith.constant 0 : i32
    return %c0_i32, %c0_i32_0 : i32, i32
  }
  func.func @transform_6(%arg0: i32) -> (i32, i32) {
    %c0_i32 = arith.constant 0 : i32
    %c0_i32_0 = arith.constant 0 : i32
    %c0_i32_1 = arith.constant 0 : i32
    return %c0_i32, %c0_i32_0 : i32, i32
  }
  func.func @transform_7(%arg0: i32) -> (i32, i32) {
    %c0_i32 = arith.constant 0 : i32
    %c0_i32_0 = arith.constant 0 : i32
    return %c0_i32, %arg0 : i32, i32
  }
}

</mosaic_0001>

<bundles_post_ra>
// kernel: simple_binary_classifier_forward.1
= control target key start
LH: loop header
LB: loop body
LE: loop exit
PB: predicated region body
PF: predicated region fallthrough
CT: control target
= control target key end

     0   :  { %vm107_vm0 = vcmask 261120   ;;  %vm688_vm1 = vmmov 0   ;;  %vm446_vm2 = vcmask 523264   ;;  %s824_s1 = inlined_call_operand.vmem [shape: bf16[32,128], index: 1, kind: input, shape index: {}]   ;;  %s825_s0 = inlined_call_operand.vmem [shape: bf16[128,32], index: 0, kind: input, shape index: {}]   ;;  %s826_s3 = inlined_call_operand.vmem [shape: bf16[128,64], index: 3, kind: input, shape index: {}]   ;;  %s827_s2 = inlined_call_operand.vmem [shape: f32[1,128], index: 2, kind: input, shape index: {}]   ;;  %s828_s4 = inlined_call_operand.vmem [shape: f32[1,64], index: 4, kind: input, shape index: {}]   ;;  %s829_s5 = inlined_call_operand.vmem [shape: bf16[8,64], index: 5, kind: input, shape index: {}]   ;;  %s830_s6 = inlined_call_operand.<no memory space> [shape: f32[1,1], index: 6, kind: input, shape index: {}]   ;;  %s831_s7 = inlined_call_operand.vmem [shape: f32[1,128], index: 7, kind: output, shape index: {}]  }
   0x1   :  { %v665_v0 = vld [vmem:[%s824_s1] sm:$0xff]   ;;  %v666_v1 = vld [vmem:[%s824_s1 + $0x8] sm:$0xff]   ;;  %v669_v4 = vld [vmem:[%s825_s0 + $0x10] sm:$0xff]  }
   0x2   :  { %591 = vmatprep.subr.bf16.mxu1 %v665_v0  ;;  %v667_v2 = vld [vmem:[%s825_s0] sm:$0xff]   ;;  %v668_v3 = vld [vmem:[%s825_s0 + $0x8] sm:$0xff]   ;;  %v670_v7 = vld [vmem:[%s825_s0 + $0x18] sm:$0xff]  }
   0x3   :  { %592 = vmatpush3.bf16.msra.mxu1 %v665_v0  ;;  %595 = vmatprep.mubr.msk.bf16.mxu1 %vm107_vm0, %v667_v2  ;;  %v675_v5 = vld [vmem:[%s826_s3] sm:$0xff]   ;;  %v676_v6 = vld [vmem:[%s826_s3 + $0x8] sm:$0xff]   ;;  %v677_v8 = vld [vmem:[%s826_s3 + $0x10] sm:$0xff]  }
   0x4   :  { %593 = vmatprep.subr.bf16.mxu1 %v666_v1  ;;  %v671_v9 = vld [vmem:[%s825_s0 + $0x20] sm:$0xff]   ;;  %v678_v10 = vld [vmem:[%s826_s3 + $0x18] sm:$0xff]   ;;  %v672_v11 = vld [vmem:[%s825_s0 + $0x28] sm:$0xff]  }
   0x5   :  { %v679_v12 = vld [vmem:[%s826_s3 + $0x20] sm:$0xff]   ;;  %v673_v13 = vld [vmem:[%s825_s0 + $0x30] sm:$0xff]   ;;  %v680_v14 = vld [vmem:[%s826_s3 + $0x28] sm:$0xff]  }
   0x6   :  { %v674_v15 = vld [vmem:[%s825_s0 + $0x38] sm:$0xff]   ;;  %v681_v16 = vld [vmem:[%s826_s3 + $0x30] sm:$0xff]   ;;  %v527_v18 = vld [vmem:[%s827_s2] ss:$0 sm:$0xff] }
   0x7   :  { %594 = vmatpush3.bf16.msra.mxu1 %v666_v1  ;;  %v682_v17 = vld [vmem:[%s826_s3 + $0x38] sm:$0xff]  }
   0x8   :  { %611 = vmatprep.subr.bf16.mxu1 %v675_v5 }
   0xa   :  { %596 = vmatmul.mubr.msk.bf16.vlgmr.msra.gmra.mrb[0].mxu1 %vm107_vm0, %v668_v3 }
   0xb   :  { %599 = vmatprep.mubr.msk.bf16.mxu1 %vm107_vm0, %v669_v4  ;;  %612 = vmatpush3.bf16.msra.mxu1 %v675_v5 }
   0xc   :  { %613 = vmatprep.subr.bf16.mxu1 %v676_v6 }
   0xf   :  { %614 = vmatpush3.bf16.msra.mxu1 %v676_v6 }
  0x10   :  { %615 = vmatprep.subr.bf16.mxu1 %v677_v8 }
  0x12   :  { %600 = vmatmul.mubr.msk.bf16.gmra.mrb[4].mxu1 %vm107_vm0, %v670_v7 }
  0x13   :  { %603 = vmatprep.mubr.msk.bf16.mxu1 %vm107_vm0, %v671_v9  ;;  %616 = vmatpush3.bf16.msra.mxu1 %v677_v8 }
  0x14   :  { %617 = vmatprep.subr.bf16.mxu1 %v678_v10 }
  0x17   :  { %618 = vmatpush3.bf16.msra.mxu1 %v678_v10 }
  0x18   :  { %619 = vmatprep.subr.bf16.mxu1 %v679_v12 }
  0x1a   :  { %604 = vmatmul.mubr.msk.bf16.gmra.mrb[8].mxu1 %vm107_vm0, %v672_v11  ;;  %v687_v11 = vmov 0.0  }
  0x1b   :  { %607 = vmatprep.mubr.msk.bf16.mxu1 %vm107_vm0, %v673_v13  ;;  %620 = vmatpush3.bf16.msra.mxu1 %v679_v12  ;;  %v546_v12 = vld [vmem:[%s828_s4] ss:$0 sm:$0xff] }
  0x1c   :  { %621 = vmatprep.subr.bf16.mxu1 %v680_v14  ;;  %643 = vmatprep.subr.bf16.mxu0 %v687_v11 }
  0x1d   :  { %659 = vmatprep.mubr.msk.bf16.mxu0 %vm688_vm1, %v687_v11 }
  0x1f   :  { %622 = vmatpush3.bf16.msra.mxu1 %v680_v14 }
  0x20   :  { %623 = vmatprep.subr.bf16.mxu1 %v681_v16 }
  0x22   :  { %608 = vmatmul.mubr.msk.bf16.gmra.mrb[12].mxu1 %vm107_vm0, %v674_v15 }
  0x23   :  { %624 = vmatpush3.bf16.msra.mxu1 %v681_v16 }
  0x24   :  { %625 = vmatprep.subr.bf16.mxu1 %v682_v17 }
  0x27   :  { %626 = vmatpush3.bf16.msra.mxu1 %v682_v17 }
  0xdd   :  { %v597_v19 = vpop.f32.mrb[0].mxu1 }
  0xde   :  { %v175_v20 = vadd.f32 %v597_v19, %v527_v18  ;;  %v166_v21 = vpop.f32.mrb[1].mxu1 }
  0xdf   :  { %v167_v22 = vadd.f32 %v527_v18, %v166_v21  ;;  %v598_v23 = vpop.f32.mrb[2].mxu1 }
  0xe0   :  { %v178_v24 = vadd.f32 %v598_v23, %v527_v18  ;;  %v169_v25 = vpop.f32.mrb[3].mxu1  ;;  %v231_v27 = vmax.f32 %v175_v20, 0.0 }
  0xe1   :  { %v170_v26 = vadd.f32 %v527_v18, %v169_v25  ;;  %v229_v29 = vmax.f32 %v167_v22, 0.0 }
  0xe2   :  { %v232_v28 = vmax.f32 %v178_v24, 0.0 }
  0xe3   :  { %v230_v30 = vmax.f32 %v170_v26, 0.0 }
  0xe4   :  { %v246_v31 = vpack.c.bf16 %v232_v28, %v231_v27 }
  0xe5   :  { %v245_v32 = vpack.c.bf16 %v230_v30, %v229_v29  ;;  %v601_v33 = vpop.f32.mrb[4].mxu1 }
  0xe6   :  { %v191_v34 = vadd.f32 %v601_v33, %v527_v18  ;;  %v182_v35 = vpop.f32.mrb[5].mxu1 }
  0xe7   :  { %v183_v36 = vadd.f32 %v527_v18, %v182_v35  ;;  %627 = vmatprep.mubr.bf16.mxu1 %v245_v32  ;;  %v602_v37 = vpop.f32.mrb[6].mxu1 }
  0xe8   :  { %v235_v38 = vmax.f32 %v191_v34, 0.0  ;;  %v194_v39 = vadd.f32 %v602_v37, %v527_v18  ;;  %628 = vmatmul.mubr.bf16.vlgmr.msra.gmra.mrb[16].mxu1 %v246_v31  ;;  %v185_v40 = vpop.f32.mrb[7].mxu1 }
  0xe9   :  { %v233_v41 = vmax.f32 %v183_v36, 0.0  ;;  %v186_v42 = vadd.f32 %v527_v18, %v185_v40 }
  0xea   :  { %v236_v43 = vmax.f32 %v194_v39, 0.0 }
  0xeb   :  { %v234_v44 = vmax.f32 %v186_v42, 0.0 }
  0xec   :  { %v248_v45 = vpack.c.bf16 %v236_v43, %v235_v38 }
  0xed   :  { %v247_v46 = vpack.c.bf16 %v234_v44, %v233_v41  ;;  %v605_v47 = vpop.f32.mrb[8].mxu1 }
  0xee   :  { %v207_v48 = vadd.f32 %v605_v47, %v527_v18  ;;  %v198_v49 = vpop.f32.mrb[9].mxu1 }
  0xef   :  { %631 = vmatprep.mubr.bf16.mxu1 %v247_v46  ;;  %v199_v50 = vadd.f32 %v527_v18, %v198_v49  ;;  %v606_v51 = vpop.f32.mrb[10].mxu1 }
  0xf0   :  { %632 = vmatmul.mubr.bf16.gmra.mrb[20].mxu1 %v248_v45  ;;  %v239_v52 = vmax.f32 %v207_v48, 0.0  ;;  %v210_v53 = vadd.f32 %v606_v51, %v527_v18  ;;  %v201_v54 = vpop.f32.mrb[11].mxu1 }
  0xf1   :  { %v237_v55 = vmax.f32 %v199_v50, 0.0  ;;  %v202_v56 = vadd.f32 %v527_v18, %v201_v54 }
  0xf2   :  { %v240_v57 = vmax.f32 %v210_v53, 0.0 }
  0xf3   :  { %v238_v58 = vmax.f32 %v202_v56, 0.0 }
  0xf4   :  { %v250_v59 = vpack.c.bf16 %v240_v57, %v239_v52 }
  0xf5   :  { %v249_v60 = vpack.c.bf16 %v238_v58, %v237_v55  ;;  %v609_v61 = vpop.f32.mrb[12].mxu1 }
  0xf6   :  { %v223_v62 = vadd.f32 %v609_v61, %v527_v18  ;;  %v214_v63 = vpop.f32.mrb[13].mxu1 }
  0xf7   :  { %635 = vmatprep.mubr.bf16.mxu1 %v249_v60  ;;  %v215_v0 = vadd.f32 %v527_v18, %v214_v63  ;;  %v610_v1 = vpop.f32.mrb[14].mxu1 }
  0xf8   :  { %636 = vmatmul.mubr.bf16.gmra.mrb[24].mxu1 %v250_v59  ;;  %v243_v2 = vmax.f32 %v223_v62, 0.0  ;;  %v226_v3 = vadd.f32 %v610_v1, %v527_v18  ;;  %v217_v4 = vpop.f32.mrb[15].mxu1 }
  0xf9   :  { %v241_v5 = vmax.f32 %v215_v0, 0.0  ;;  %v218_v6 = vadd.f32 %v527_v18, %v217_v4 }
  0xfa   :  { %v244_v7 = vmax.f32 %v226_v3, 0.0 }
  0xfb   :  { %v242_v8 = vmax.f32 %v218_v6, 0.0 }
  0xfc   :  { %v252_v9 = vpack.c.bf16 %v244_v7, %v243_v2 }
  0xfd   :  { %v251_v10 = vpack.c.bf16 %v242_v8, %v241_v5 }
  0xff   :  { %639 = vmatprep.mubr.bf16.mxu1 %v251_v10 }
 0x100   :  { %640 = vmatmul.mubr.bf16.gmra.mrb[28].mxu1 %v252_v9 }
 0x1bb   :  { %v629_v13 = vpop.f32.mrb[16].mxu1 }
 0x1bc   :  { %v367_v14 = vadd.f32 %v629_v13, %v546_v12  ;;  %v358_v15 = vpop.f32.mrb[17].mxu1 }
 0x1bd   :  { %v359_v16 = vadd.f32 %v546_v12, %v358_v15  ;;  %v630_v17 = vpop.f32.mrb[18].mxu1  ;;  %v515_v15 = vstv %s830_s6 }
 0x1be   :  { %v370_v18 = vadd.f32 %v630_v17, %v546_v12  ;;  %v361_v19 = vpop.f32.mrb[19].mxu1  ;;  %v423_v21 = vmax.f32 %v367_v14, 0.0  ;;  %v445_v14 = vld [vmem:[%s829_s5] sm:$0xf] }
 0x1bf   :  { %v362_v20 = vadd.f32 %v546_v12, %v361_v19  ;;  %v421_v23 = vmax.f32 %v359_v16, 0.0 }
 0x1c0   :  { %v424_v22 = vmax.f32 %v370_v18, 0.0 }
 0x1c1   :  { %v422_v24 = vmax.f32 %v362_v20, 0.0 }
 0x1c2   :  { %v438_v25 = vpack.c.bf16 %v424_v22, %v423_v21 }
 0x1c3   :  { %v633_v26 = vpop.f32.mrb[20].mxu1  ;;  %v437_v27 = vpack.c.bf16 %v422_v24, %v421_v23 }
 0x1c4   :  { %v383_v28 = vadd.f32 %v633_v26, %v546_v12  ;;  %v374_v29 = vpop.f32.mrb[21].mxu1  ;;  %v454_v45 = vsel %vm446_vm2, %v438_v25, 0 }
 0x1c5   :  { %v375_v30 = vadd.f32 %v546_v12, %v374_v29  ;;  %v634_v31 = vpop.f32.mrb[22].mxu1  ;;  %v451_v32 = vsel %vm446_vm2, %v437_v27, 0 }
 0x1c6   :  { %v427_v33 = vmax.f32 %v383_v28, 0.0  ;;  %v386_v34 = vadd.f32 %v634_v31, %v546_v12  ;;  %644 = vmatpush3.bf16.xpose.msra.mxu0 %v451_v32  ;;  %v377_v35 = vpop.f32.mrb[23].mxu1 }
 0x1c7   :  { %v425_v36 = vmax.f32 %v375_v30, 0.0  ;;  %v378_v37 = vadd.f32 %v546_v12, %v377_v35  ;;  %645 = vmatprep.subr.bf16.mxu0 %v687_v11 }
 0x1c8   :  { %v428_v38 = vmax.f32 %v386_v34, 0.0 }
 0x1c9   :  { %v426_v39 = vmax.f32 %v378_v37, 0.0 }
 0x1ca   :  { %v440_v40 = vpack.c.bf16 %v428_v38, %v427_v33 }
 0x1cb   :  { %v439_v41 = vpack.c.bf16 %v426_v39, %v425_v36  ;;  %v637_v42 = vpop.f32.mrb[24].mxu1 }
 0x1cc   :  { %v399_v43 = vadd.f32 %v637_v42, %v546_v12  ;;  %v390_v44 = vpop.f32.mrb[25].mxu1  ;;  %v460_v8 = vsel %vm446_vm2, %v440_v40, 0 }
 0x1cd   :  { %v391_v46 = vadd.f32 %v546_v12, %v390_v44  ;;  %v638_v47 = vpop.f32.mrb[26].mxu1  ;;  %v457_v60 = vsel %vm446_vm2, %v439_v41, 0 }
 0x1ce   :  { %646 = vmatpush3.bf16.xpose.msra.mxu0 %v454_v45  ;;  %v431_v48 = vmax.f32 %v399_v43, 0.0  ;;  %v402_v49 = vadd.f32 %v638_v47, %v546_v12  ;;  %v393_v50 = vpop.f32.mrb[27].mxu1 }
 0x1cf   :  { %v429_v51 = vmax.f32 %v391_v46, 0.0  ;;  %647 = vmatprep.subr.bf16.mxu0 %v687_v11  ;;  %v394_v52 = vadd.f32 %v546_v12, %v393_v50 }
 0x1d0   :  { %v432_v53 = vmax.f32 %v402_v49, 0.0 }
 0x1d1   :  { %v430_v54 = vmax.f32 %v394_v52, 0.0 }
 0x1d2   :  { %v442_v55 = vpack.c.bf16 %v432_v53, %v431_v48 }
 0x1d3   :  { %v441_v56 = vpack.c.bf16 %v430_v54, %v429_v51  ;;  %v641_v57 = vpop.f32.mrb[28].mxu1 }
 0x1d4   :  { %v415_v58 = vadd.f32 %v641_v57, %v546_v12  ;;  %v406_v59 = vpop.f32.mrb[29].mxu1  ;;  %v466_v10 = vsel %vm446_vm2, %v442_v55, 0 }
 0x1d5   :  { %v407_v61 = vadd.f32 %v546_v12, %v406_v59  ;;  %v642_v62 = vpop.f32.mrb[30].mxu1  ;;  %v463_v9 = vsel %vm446_vm2, %v441_v56, 0 }
 0x1d6   :  { %648 = vmatpush3.bf16.xpose.msra.mxu0 %v457_v60  ;;  %v435_v63 = vmax.f32 %v415_v58, 0.0  ;;  %v418_v0 = vadd.f32 %v642_v62, %v546_v12  ;;  %v409_v1 = vpop.f32.mrb[31].mxu1 }
 0x1d7   :  { %649 = vmatprep.subr.bf16.mxu0 %v687_v11  ;;  %v433_v2 = vmax.f32 %v407_v61, 0.0  ;;  %v410_v3 = vadd.f32 %v546_v12, %v409_v1 }
 0x1d8   :  { %v436_v4 = vmax.f32 %v418_v0, 0.0 }
 0x1d9   :  { %v434_v5 = vmax.f32 %v410_v3, 0.0 }
 0x1da   :  { %v444_v6 = vpack.c.bf16 %v436_v4, %v435_v63 }
 0x1db   :  { %v443_v7 = vpack.c.bf16 %v434_v5, %v433_v2 }
 0x1dc   :  { %v472_v13 = vsel %vm446_vm2, %v444_v6, 0 }
 0x1dd   :  { %v469_v12 = vsel %vm446_vm2, %v443_v7, 0 }
 0x1de   :  { %650 = vmatpush3.bf16.xpose.msra.mxu0 %v460_v8 }
 0x1df   :  { %651 = vmatprep.subr.bf16.mxu0 %v687_v11 }
 0x1e6   :  { %652 = vmatpush3.bf16.xpose.msra.mxu0 %v463_v9 }
 0x1e7   :  { %653 = vmatprep.subr.bf16.mxu0 %v687_v11 }
 0x1ee   :  { %654 = vmatpush3.bf16.xpose.msra.mxu0 %v466_v10 }
 0x1ef   :  { %655 = vmatprep.subr.bf16.mxu0 %v687_v11 }
 0x1f6   :  { %656 = vmatpush3.bf16.xpose.msra.mxu0 %v469_v12 }
 0x1f7   :  { %657 = vmatprep.subr.bf16.mxu0 %v687_v11 }
 0x1fe   :  { %658 = vmatpush3.bf16.xpose.msra.mxu0 %v472_v13 }
 0x205   :  { %660 = vmatmul.mubr.msk.bf16.vlgmr.msra.gmra.mrb[0].mxu0 %vm446_vm2, %v445_v14 }
 0x2d8   :  { %v508_v16 = vpop.f32.mrb[0].mxu0 }
 0x2d9   :  { %v516_v17 = vadd.f32 %v515_v15, %v508_v16  ;;  %v661_v18 = vpop.f32.mrb[1].mxu0 }
 0x2da   :  { %v511_v19 = vpop.f32.mrb[2].mxu0 }
 0x2db   :  { %v517_v20 = vsub.f32 0.0, %v516_v17  ;;  %v662_v21 = vpop.f32.mrb[3].mxu0 }
 0x2dd   :  { %v518_v11 = vmul.f32 1.442695, %v517_v20 }
 0x2df   :  { %683 = vpow2.f32 %v518_v11 }
 0x2e9   :  { %v684_v22 = vpop.eup %683 }
 0x2ea   :  { %v520_v23 = vadd.f32 1.0, %v684_v22 }
 0x2ec   :  { %685 = vrcp.f32 %v520_v23 }
 0x2f6   :  { %v686_v24 = vpop.eup %685 }
 0x2f7   :  { %522 = vst [vmem:[%s831_s7] sm:$0x1] %v686_v24 }

</bundles_post_ra>
